<compile_context>
chip_gen: v7x
topology: tpu7x:2x2x1
jax: 0.10.0
libtpu: 0.0.40
codegen_flags: <defaults>
</compile_context>

<pallas_src>
import numpy as np
import jax
import jax.numpy as jnp
from jax.experimental import pallas as pl
from jax.experimental.pallas import tpu as pltpu


def _round_up(n, m):
    return ((n + m - 1) // m) * m


def _build_conv_pool_mat(w, b, H, W, col_of, n_cols):
    """Conv2d(3x3, stride 1, pad 1) folded to a dense matrix whose output
    columns are placed according to `col_of(k, idx)`, where k in 0..3 is the
    2x2/stride-2 maxpool window slot and idx = (co*Ho + hp)*Wo + wp is the
    NCHW-flattened pooled position.

    Returns (numpy):
      A: (Cin*H*W, n_cols)  conv-as-matmul Toeplitz matrix
      c: (1,       n_cols)  per-column bias b[co] (0 on unused columns)
    """
    w = np.asarray(w, dtype=np.float32)
    b = np.asarray(b, dtype=np.float32)
    Cout, Cin, KH, KW = w.shape
    Ho, Wo = H // 2, W // 2
    A = np.zeros((Cin * H * W, n_cols), dtype=np.float32)
    c = np.zeros((1, n_cols), dtype=np.float32)
    for k in range(4):                      # slot inside the 2x2 pool window
        kh, kw = divmod(k, 2)
        for co in range(Cout):
            for hp in range(Ho):
                for wp in range(Wo):
                    h = 2 * hp + kh
                    ww = 2 * wp + kw
                    idx = (co * Ho + hp) * Wo + wp
                    j = col_of(k, idx)
                    c[0, j] = b[co]
                    for ci in range(Cin):
                        for dh in range(KH):
                            for dw in range(KW):
                                hi = h + dh - 1       # padding = 1
                                wi = ww + dw - 1
                                if 0 <= hi < H and 0 <= wi < W:
                                    A[(ci * H + hi) * W + wi, j] += w[co, ci, dh, dw]
    return A, c


def _cnn_kernel(x_ref, a1_ref, c1_ref, a2_ref, c2_ref,
                w3_ref, b3_ref, w4_ref, b4_ref, o_ref):
    # In-kernel bf16 cast of the f32 input (no separate wrapper HBM pass).
    xb = x_ref[...].astype(jnp.bfloat16)

    # conv1 (bf16 matmul, f32 acc) + bias + ReLU; columns pre-permuted so the
    # 2x2 maxpool is a 4-way max of lane-aligned 128-wide slabs (no zero cols).
    z1 = jnp.dot(xb, a1_ref[...], preferred_element_type=jnp.float32) + c1_ref[...]
    z1 = jnp.maximum(z1, 0.0)
    n1 = z1.shape[-1] // 4
    p1 = jnp.maximum(jnp.maximum(z1[:, :n1],           z1[:, n1:2 * n1]),
                     jnp.maximum(z1[:, 2 * n1:3 * n1], z1[:, 3 * n1:]))

    # conv2 + bias + ReLU; the four 64-wide pool slots are packed into two
    # 128-lane slabs (no zero-padded MXU columns). Pool = slab-vs-slab max,
    # then a lane rotate (XLU) + max; lanes 64..127 of p2 end up duplicated
    # and hit zero rows of w3 (harmless).
    z2 = jnp.dot(p1.astype(jnp.bfloat16), a2_ref[...],
                 preferred_element_type=jnp.float32) + c2_ref[...]
    z2 = jnp.maximum(z2, 0.0)
    half = z2.shape[-1] // 2
    m = jnp.maximum(z2[:, :half], z2[:, half:])
    p2 = jnp.maximum(m, pltpu.roll(m, half // 2, axis=1))

    # p2 cols 0..63 match PyTorch X.view(B, -1) of the pooled NCHW tensor.
    # TODO(synk): nn.Dropout(p=0) is the identity in this forward; omitted.
    h = jnp.maximum(jnp.dot(p2.astype(jnp.bfloat16), w3_ref[...],
                            preferred_element_type=jnp.float32) + b3_ref[...], 0.0)
    # Lane-dense 128-wide f32 output store; wrapper slices to the 2 real logits.
    o_ref[...] = jnp.dot(h.astype(jnp.bfloat16), w4_ref[...],
                         preferred_element_type=jnp.float32) + b4_ref[...]


def make_cnn_forward(params, input_dim=16, input_channels=1,
                     max_tb=1024, target_steps=8):
    """Builds+uploads the constant matrices ONCE and returns a jitted forward."""
    (w1, b1, w2, b2, w3, b3, w4, b4) = params
    H = W = int(input_dim)
    w1n, w2n = np.asarray(w1), np.asarray(w2)
    w3n, w4n = np.asarray(w3, np.float32), np.asarray(w4, np.float32)
    cout1, cout2 = w1n.shape[0], w2n.shape[0]

    # conv1: slab of pooled outputs = 2 * 8 * 8 = 128 (already lane-aligned).
    slab1 = cout1 * (H // 2) * (W // 2)
    slab1_p = _round_up(slab1, 128)              # 128
    n1c = 4 * slab1_p                            # 512
    A1, c1 = _build_conv_pool_mat(
        w1, b1, H, W, lambda k, idx: k * slab1_p + idx, n1c)   # (256, 512)

    # conv2: slab = 4 * 4 * 4 = 64; pack slot pairs into 128-lane slabs.
    slab2 = cout2 * (H // 4) * (W // 4)
    assert 2 * slab2 == 128, "slot packing assumes conv2 pool-slab width 64"
    n2c = 2 * 128                                # 256 (no zero columns)
    A2, c2 = _build_conv_pool_mat(
        w2, b2, H // 2, W // 2,
        lambda k, idx: (k // 2) * 128 + (k % 2) * slab2 + idx, n2c)  # (128, 256)

    n_hidden, n_out = w3n.shape[0], w4n.shape[0]     # 20, 2
    hid_p = _round_up(n_hidden, 128)                 # 128
    out_p = _round_up(n_out, 128)                    # 128

    w3t = np.zeros((2 * slab2, hid_p), np.float32)   # (128, 128)
    w3t[:slab2, :n_hidden] = w3n.T                   # rows 64..127 stay zero
    b3r = np.zeros((1, hid_p), np.float32)
    b3r[0, :n_hidden] = np.asarray(b3, np.float32)
    w4t = np.zeros((hid_p, out_p), np.float32)
    w4t[:n_hidden, :n_out] = w4n.T
    b4r = np.zeros((1, out_p), np.float32)
    b4r[0, :n_out] = np.asarray(b4, np.float32)

    # Upload once. Matmul operands in bf16 (native MXU), biases stay f32.
    A1d = jnp.asarray(A1, jnp.bfloat16)
    A2d = jnp.asarray(A2, jnp.bfloat16)
    w3d = jnp.asarray(w3t, jnp.bfloat16)
    w4d = jnp.asarray(w4t, jnp.bfloat16)
    c1d = jnp.asarray(c1, jnp.float32)
    c2d = jnp.asarray(c2, jnp.float32)
    b3d = jnp.asarray(b3r, jnp.float32)
    b4d = jnp.asarray(b4r, jnp.float32)

    k_in = input_channels * H * W                # 256

    @jax.jit
    def forward(x_nchw):
        B = x_nchw.shape[0]
        # Pick TB from a target step count: bounds batch-padding waste to a
        # few rows and keeps >= 2 grid steps for realistic B so v7x can shard
        # the batch across its 2 TensorCores ("parallel" axis). Multiple of 16
        # keeps sublane packing happy for the bf16 matmul operands.
        TB = max(16, min(int(max_tb),
                         _round_up(-(-B // int(target_steps)), 16)))
        B_pad = _round_up(B, TB)
        x2d = x_nchw.reshape(B, k_in)            # f32; cast happens in-kernel
        if B_pad != B:
            x2d = jnp.pad(x2d, ((0, B_pad - B), (0, 0)))

        const = lambda i: (0, 0)
        out = pl.pallas_call(
            _cnn_kernel,
            out_shape=jax.ShapeDtypeStruct((B_pad, out_p), jnp.float32),
            grid=(B_pad // TB,),
            in_specs=[
                pl.BlockSpec((TB, k_in), lambda i: (i, 0)),     # x (pipelined)
                pl.BlockSpec((k_in, n1c), const),               # A1 (resident)
                pl.BlockSpec((1, n1c), const),                  # c1
                pl.BlockSpec((2 * slab2, n2c), const),          # A2 (packed)
                pl.BlockSpec((1, n2c), const),                  # c2
                pl.BlockSpec((2 * slab2, hid_p), const),        # w3^T (padded)
                pl.BlockSpec((1, hid_p), const),                # b3
                pl.BlockSpec((hid_p, out_p), const),            # w4^T (padded)
                pl.BlockSpec((1, out_p), const),                # b4
            ],
            out_specs=pl.BlockSpec((TB, out_p), lambda i: (i, 0)),
            compiler_params=pltpu.CompilerParams(
                dimension_semantics=("parallel",),
                vmem_limit_bytes=32 * 1024 * 1024),
        )(x2d, A1d, c1d, A2d, c2d, w3d, b3d, w4d, b4d)
        return out[:B, :n_out]

    return forward


def init_params(key, multiplier=1.0):
    """Deterministic PyTorch-default-style uniform init (U(-1/sqrt(fan_in), ...))."""
    def unif(k, shape, fan_in):
        bound = 1.0 / float(np.sqrt(fan_in))
        return jax.random.uniform(k, shape, jnp.float32, -bound, bound)
    ks = jax.random.split(key, 8)
    w1 = unif(ks[0], (2, 1, 3, 3), 1 * 9)
    b1 = unif(ks[1], (2,),         1 * 9)
    w2 = unif(ks[2], (4, 2, 3, 3), 2 * 9)
    b2 = unif(ks[3], (4,),         2 * 9)
    w3 = unif(ks[4], (20, 64), 64)
    b3 = unif(ks[5], (20,),    64)
    w4 = unif(ks[6], (2, 20), 20)
    b4 = unif(ks[7], (2,),    20)
    return tuple(multiplier * p for p in (w1, b1, w2, b2, w3, b3, w4, b4))


def _pool(x):
    return jax.lax.reduce_window(x, -jnp.inf, jax.lax.max,
                                 (1, 1, 2, 2), (1, 1, 2, 2), "VALID")


def reference_forward(x_nchw, params):
    """Pure-JAX f32 reference reproducing the PyTorch module semantics."""
    (w1, b1, w2, b2, w3, b3, w4, b4) = params

    def conv(x, w, b):
        y = jax.lax.conv_general_dilated(
            x, w, window_strides=(1, 1), padding=((1, 1), (1, 1)),
            dimension_numbers=("NCHW", "OIHW", "NCHW"))
        return y + b[None, :, None, None]

    y = _pool(jax.nn.relu(conv(x_nchw, w1, b1)))
    y = _pool(jax.nn.relu(conv(y, w2, b2)))
    y = y.reshape(y.shape[0], -1)
    y = jax.nn.relu(y @ w3.T + b3)
    return y @ w4.T + b4


def reference_forward_mixed(x_nchw, params):
    """Reference with the kernel's numerics: bf16 matmul/conv operands,
    f32 accumulation, f32 bias/ReLU/pool."""
    (w1, b1, w2, b2, w3, b3, w4, b4) = params
    bf = jnp.bfloat16

    def conv(x, w, b):
        y = jax.lax.conv_general_dilated(
            x.astype(bf), w.astype(bf), window_strides=(1, 1),
            padding=((1, 1), (1, 1)),
            dimension_numbers=("NCHW", "OIHW", "NCHW"),
            preferred_element_type=jnp.float32)
        return y + b[None, :, None, None]

    y = _pool(jax.nn.relu(conv(x_nchw, w1, b1)))
    y = _pool(jax.nn.relu(conv(y, w2, b2)))
    y = y.reshape(y.shape[0], -1)
    h = jax.nn.relu(jnp.dot(y.astype(bf), w3.T.astype(bf),
                            preferred_element_type=jnp.float32) + b3)
    return jnp.dot(h.astype(bf), w4.T.astype(bf),
                   preferred_element_type=jnp.float32) + b4


if __name__ == "__main__":
    key = jax.random.PRNGKey(0)
    pkey, xkey = jax.random.split(key)

    params = init_params(pkey, multiplier=1.0)   # weight_multiplier = 1
    B = 2
    # Ising-like spin configurations, single channel, 16x16 lattice.
    x = jnp.sign(jax.random.uniform(xkey, (B, 1, 16, 16), jnp.float32, -1.0, 1.0))
    x = jnp.where(x == 0, 1.0, x).astype(jnp.float32)

    forward = make_cnn_forward(params)           # constants built/uploaded once
    out = jax.block_until_ready(forward(x))
    assert out.shape == (B, 2), out.shape

    # Tight check vs a reference with identical (bf16-operand, f32-acc) numerics.
    ref_mixed = reference_forward_mixed(x, params)
    np.testing.assert_allclose(np.asarray(out), np.asarray(ref_mixed),
                               rtol=5e-3, atol=5e-3)
    # Loose check vs the full-f32 PyTorch-semantics reference (bf16 weight rounding).
    ref_f32 = reference_forward(x, params)
    np.testing.assert_allclose(np.asarray(out), np.asarray(ref_f32),
                               rtol=5e-2, atol=5e-2)

    print("KERNEL_OK")
</pallas_src>

<mosaic_0001>
module attributes {stable_mosaic.version = 11 : i64} {
  func.func @_cnn_kernel(%arg0: i32, %arg1: memref<16x256xf32, #tpu.memory_space<vmem>>, %arg2: memref<256x512xbf16, #tpu.memory_space<vmem>>, %arg3: memref<1x512xf32, #tpu.memory_space<vmem>>, %arg4: memref<128x256xbf16, #tpu.memory_space<vmem>>, %arg5: memref<1x256xf32, #tpu.memory_space<vmem>>, %arg6: memref<128x128xbf16, #tpu.memory_space<vmem>>, %arg7: memref<1x128xf32, #tpu.memory_space<vmem>>, %arg8: memref<128x128xbf16, #tpu.memory_space<vmem>>, %arg9: memref<1x128xf32, #tpu.memory_space<vmem>>, %arg10: memref<16x128xf32, #tpu.memory_space<vmem>>) attributes {dimension_semantics = [#tpu.dimension_semantics<parallel>], iteration_bounds = array<i64: 1>, scalar_prefetch = 0 : i64, scratch_operands = 0 : i64, tpu.core_type = #tpu.core_type<tc>, window_params = [{transform_indices = @transform_0, window_bounds = array<i64: 16, 256>}, {pipeline_mode = #tpu.pipeline_mode<synchronous>, transform_indices = @transform_1, window_bounds = array<i64: 256, 512>}, {pipeline_mode = #tpu.pipeline_mode<synchronous>, transform_indices = @transform_2, window_bounds = array<i64: 1, 512>}, {pipeline_mode = #tpu.pipeline_mode<synchronous>, transform_indices = @transform_3, window_bounds = array<i64: 128, 256>}, {pipeline_mode = #tpu.pipeline_mode<synchronous>, transform_indices = @transform_4, window_bounds = array<i64: 1, 256>}, {pipeline_mode = #tpu.pipeline_mode<synchronous>, transform_indices = @transform_5, window_bounds = array<i64: 128, 128>}, {pipeline_mode = #tpu.pipeline_mode<synchronous>, transform_indices = @transform_6, window_bounds = array<i64: 1, 128>}, {pipeline_mode = #tpu.pipeline_mode<synchronous>, transform_indices = @transform_7, window_bounds = array<i64: 128, 128>}, {pipeline_mode = #tpu.pipeline_mode<synchronous>, transform_indices = @transform_8, window_bounds = array<i64: 1, 128>}, {transform_indices = @transform_9, window_bounds = array<i64: 16, 128>}]} {
    %c0 = arith.constant 0 : index
    %c0_0 = arith.constant 0 : index
    %0 = vector.load %arg1[%c0, %c0_0] : memref<16x256xf32, #tpu.memory_space<vmem>>, vector<16x256xf32>
    %1 = arith.truncf %0 : vector<16x256xf32> to vector<16x256xbf16>
    %c0_1 = arith.constant 0 : index
    %c0_2 = arith.constant 0 : index
    %2 = vector.load %arg2[%c0_1, %c0_2] : memref<256x512xbf16, #tpu.memory_space<vmem>>, vector<256x512xbf16>
    %cst = arith.constant dense<0.000000e+00> : vector<16x512xf32>
    %3 = tpu.matmul %1, %2, %cst {dimension_numbers = #tpu.dot_dimension_numbers<[1], [0], [0], [1], [0, 0, 1, 1], [], []>} : vector<16x256xbf16>, vector<256x512xbf16>, vector<16x512xf32> -> vector<16x512xf32>
    %c0_3 = arith.constant 0 : index
    %c0_4 = arith.constant 0 : index
    %4 = vector.load %arg3[%c0_3, %c0_4] : memref<1x512xf32, #tpu.memory_space<vmem>>, vector<1x512xf32>
    %5 = vector.broadcast %4 : vector<1x512xf32> to vector<16x512xf32>
    %6 = arith.addf %3, %5 : vector<16x512xf32>
    %cst_5 = arith.constant 0.000000e+00 : f32
    %7 = vector.broadcast %cst_5 : f32 to vector<16x512xf32>
    %8 = arith.maximumf %6, %7 : vector<16x512xf32>
    %9 = vector.extract_strided_slice %8 {offsets = [0, 0], sizes = [16, 128], strides = [1, 1]} : vector<16x512xf32> to vector<16x128xf32>
    %10 = vector.extract_strided_slice %8 {offsets = [0, 128], sizes = [16, 128], strides = [1, 1]} : vector<16x512xf32> to vector<16x128xf32>
    %11 = arith.maximumf %9, %10 : vector<16x128xf32>
    %12 = vector.extract_strided_slice %8 {offsets = [0, 256], sizes = [16, 128], strides = [1, 1]} : vector<16x512xf32> to vector<16x128xf32>
    %13 = vector.extract_strided_slice %8 {offsets = [0, 384], sizes = [16, 128], strides = [1, 1]} : vector<16x512xf32> to vector<16x128xf32>
    %14 = arith.maximumf %12, %13 : vector<16x128xf32>
    %15 = arith.maximumf %11, %14 : vector<16x128xf32>
    %16 = arith.truncf %15 : vector<16x128xf32> to vector<16x128xbf16>
    %c0_6 = arith.constant 0 : index
    %c0_7 = arith.constant 0 : index
    %17 = vector.load %arg4[%c0_6, %c0_7] : memref<128x256xbf16, #tpu.memory_space<vmem>>, vector<128x256xbf16>
    %cst_8 = arith.constant dense<0.000000e+00> : vector<16x256xf32>
    %18 = tpu.matmul %16, %17, %cst_8 {dimension_numbers = #tpu.dot_dimension_numbers<[1], [0], [0], [1], [0, 0, 1, 1], [], []>} : vector<16x128xbf16>, vector<128x256xbf16>, vector<16x256xf32> -> vector<16x256xf32>
    %c0_9 = arith.constant 0 : index
    %c0_10 = arith.constant 0 : index
    %19 = vector.load %arg5[%c0_9, %c0_10] : memref<1x256xf32, #tpu.memory_space<vmem>>, vector<1x256xf32>
    %20 = vector.broadcast %19 : vector<1x256xf32> to vector<16x256xf32>
    %21 = arith.addf %18, %20 : vector<16x256xf32>
    %cst_11 = arith.constant 0.000000e+00 : f32
    %22 = vector.broadcast %cst_11 : f32 to vector<16x256xf32>
    %23 = arith.maximumf %21, %22 : vector<16x256xf32>
    %24 = vector.extract_strided_slice %23 {offsets = [0, 0], sizes = [16, 128], strides = [1, 1]} : vector<16x256xf32> to vector<16x128xf32>
    %25 = vector.extract_strided_slice %23 {offsets = [0, 128], sizes = [16, 128], strides = [1, 1]} : vector<16x256xf32> to vector<16x128xf32>
    %26 = arith.maximumf %24, %25 : vector<16x128xf32>
    %c64_i32 = arith.constant 64 : i32
    %27 = tpu.dynamic_rotate %26 by %c64_i32 dim 1 : vector<16x128xf32>, i32 -> vector<16x128xf32>
    %28 = arith.maximumf %26, %27 : vector<16x128xf32>
    %29 = arith.truncf %28 : vector<16x128xf32> to vector<16x128xbf16>
    %c0_12 = arith.constant 0 : index
    %c0_13 = arith.constant 0 : index
    %30 = vector.load %arg6[%c0_12, %c0_13] : memref<128x128xbf16, #tpu.memory_space<vmem>>, vector<128x128xbf16>
    %cst_14 = arith.constant dense<0.000000e+00> : vector<16x128xf32>
    %31 = tpu.matmul %29, %30, %cst_14 {dimension_numbers = #tpu.dot_dimension_numbers<[1], [0], [0], [1], [0, 0, 1, 1], [], []>} : vector<16x128xbf16>, vector<128x128xbf16>, vector<16x128xf32> -> vector<16x128xf32>
    %c0_15 = arith.constant 0 : index
    %c0_16 = arith.constant 0 : index
    %32 = vector.load %arg7[%c0_15, %c0_16] : memref<1x128xf32, #tpu.memory_space<vmem>>, vector<1x128xf32>
    %33 = vector.broadcast %32 : vector<1x128xf32> to vector<16x128xf32>
    %34 = arith.addf %31, %33 : vector<16x128xf32>
    %cst_17 = arith.constant 0.000000e+00 : f32
    %35 = vector.broadcast %cst_17 : f32 to vector<16x128xf32>
    %36 = arith.maximumf %34, %35 : vector<16x128xf32>
    %37 = arith.truncf %36 : vector<16x128xf32> to vector<16x128xbf16>
    %c0_18 = arith.constant 0 : index
    %c0_19 = arith.constant 0 : index
    %38 = vector.load %arg8[%c0_18, %c0_19] : memref<128x128xbf16, #tpu.memory_space<vmem>>, vector<128x128xbf16>
    %cst_20 = arith.constant dense<0.000000e+00> : vector<16x128xf32>
    %39 = tpu.matmul %37, %38, %cst_20 {dimension_numbers = #tpu.dot_dimension_numbers<[1], [0], [0], [1], [0, 0, 1, 1], [], []>} : vector<16x128xbf16>, vector<128x128xbf16>, vector<16x128xf32> -> vector<16x128xf32>
    %c0_21 = arith.constant 0 : index
    %c0_22 = arith.constant 0 : index
    %40 = vector.load %arg9[%c0_21, %c0_22] : memref<1x128xf32, #tpu.memory_space<vmem>>, vector<1x128xf32>
    %41 = vector.broadcast %40 : vector<1x128xf32> to vector<16x128xf32>
    %42 = arith.addf %39, %41 : vector<16x128xf32>
    %c0_23 = arith.constant 0 : index
    %c0_24 = arith.constant 0 : index
    %43 = vector.load %arg10[%c0_23, %c0_24] : memref<16x128xf32, #tpu.memory_space<vmem>>, vector<16x128xf32>
    tpu.vector_store %arg10[%c0_23, %c0_24], %42 {strides = array<i32>} : memref<16x128xf32, #tpu.memory_space<vmem>>, vector<16x128xf32>,
    return
  }
  func.func @transform_0(%arg0: i32) -> (i32, i32) {
    %c0_i32 = arith.constant 0 : i32
    %c0_i32_0 = arith.constant 0 : i32
    return %arg0, %c0_i32 : i32, i32
  }
  func.func @transform_1(%arg0: i32) -> (i32, i32) {
    %c0_i32 = arith.constant 0 : i32
    %c0_i32_0 = arith.constant 0 : i32
    %c0_i32_1 = arith.constant 0 : i32
    return %c0_i32, %c0_i32_0 : i32, i32
  }
  func.func @transform_2(%arg0: i32) -> (i32, i32) {
    %c0_i32 = arith.constant 0 : i32
    %c0_i32_0 = arith.constant 0 : i32
    %c0_i32_1 = arith.constant 0 : i32
    return %c0_i32, %c0_i32_0 : i32, i32
  }
  func.func @transform_3(%arg0: i32) -> (i32, i32) {
    %c0_i32 = arith.constant 0 : i32
    %c0_i32_0 = arith.constant 0 : i32
    %c0_i32_1 = arith.constant 0 : i32
    return %c0_i32, %c0_i32_0 : i32, i32
  }
  func.func @transform_4(%arg0: i32) -> (i32, i32) {
    %c0_i32 = arith.constant 0 : i32
    %c0_i32_0 = arith.constant 0 : i32
    %c0_i32_1 = arith.constant 0 : i32
    return %c0_i32, %c0_i32_0 : i32, i32
  }
  func.func @transform_5(%arg0: i32) -> (i32, i32) {
    %c0_i32 = arith.constant 0 : i32
    %c0_i32_0 = arith.constant 0 : i32
    %c0_i32_1 = arith.constant 0 : i32
    return %c0_i32, %c0_i32_0 : i32, i32
  }
  func.func @transform_6(%arg0: i32) -> (i32, i32) {
    %c0_i32 = arith.constant 0 : i32
    %c0_i32_0 = arith.constant 0 : i32
    %c0_i32_1 = arith.constant 0 : i32
    return %c0_i32, %c0_i32_0 : i32, i32
  }
  func.func @transform_7(%arg0: i32) -> (i32, i32) {
    %c0_i32 = arith.constant 0 : i32
    %c0_i32_0 = arith.constant 0 : i32
    %c0_i32_1 = arith.constant 0 : i32
    return %c0_i32, %c0_i32_0 : i32, i32
  }
  func.func @transform_8(%arg0: i32) -> (i32, i32) {
    %c0_i32 = arith.constant 0 : i32
    %c0_i32_0 = arith.constant 0 : i32
    %c0_i32_1 = arith.constant 0 : i32
    return %c0_i32, %c0_i32_0 : i32, i32
  }
  func.func @transform_9(%arg0: i32) -> (i32, i32) {
    %c0_i32 = arith.constant 0 : i32
    %c0_i32_0 = arith.constant 0 : i32
    return %arg0, %c0_i32 : i32, i32
  }
}

</mosaic_0001>

<bundles_post_ra>
// kernel: forward.1
= control target key start
LH: loop header
LB: loop body
LE: loop exit
PB: predicated region body
PF: predicated region fallthrough
CT: control target
= control target key end

     0   :  { %vm1246_vm0 = vmmov 0   ;;  %s1648_s1 = inlined_call_operand.vmem [shape: bf16[256,512], index: 1, kind: input, shape index: {}]   ;;  %s1649_s0 = inlined_call_operand.vmem [shape: f32[16,256], index: 0, kind: input, shape index: {}]   ;;  %s1650_s3 = inlined_call_operand.vmem [shape: bf16[128,256], index: 3, kind: input, shape index: {}]   ;;  %s1651_s2 = inlined_call_operand.vmem [shape: f32[1,512], index: 2, kind: input, shape index: {}]   ;;  %s1652_s5 = inlined_call_operand.vmem [shape: bf16[128,128], index: 5, kind: input, shape index: {}]   ;;  %s1653_s4 = inlined_call_operand.vmem [shape: f32[1,256], index: 4, kind: input, shape index: {}]   ;;  %s1654_s7 = inlined_call_operand.vmem [shape: bf16[128,128], index: 7, kind: input, shape index: {}]   ;;  %s1655_s6 = inlined_call_operand.vmem [shape: f32[1,128], index: 6, kind: input, shape index: {}]   ;;  %s1656_s8 = inlined_call_operand.vmem [shape: f32[1,128], index: 8, kind: input, shape index: {}]   ;;  %s1657_s9 = inlined_call_operand.vmem [shape: f32[16,128], index: 9, kind: output, shape index: {}]  }
   0x1   :  { %v1108_v0 = vld [vmem:[%s1648_s1 + $0x4] ss:$16 sps:$4 sm:$0xff]   ;;  %v1110_v1 = vld [vmem:[%s1648_s1 + $0xc] ss:$16 sps:$4 sm:$0xff]   ;;  %v1112_v2 = vld [vmem:[%s1648_s1] ss:$16 sps:$4 sm:$0xff]  }
   0x2   :  { %445 = vmatprep.subr.bf16.mxu0 %v1108_v0  ;;  %v1113_v3 = vld [vmem:[%s1648_s1 + $0x8] ss:$16 sps:$4 sm:$0xff]   ;;  %488 = vmatprep.subr.bf16.mxu1 %v1110_v1  ;;  %v1114_v4 = vld [vmem:[%s1648_s1 + $0x24] ss:$16 sps:$4 sm:$0xff]   ;;  %v1116_v5 = vld [vmem:[%s1648_s1 + $0x2c] ss:$16 sps:$4 sm:$0xff]  }
   0x3   :  { %446 = vmatpush1.bf16.msra.mxu0 %v1112_v2  ;;  %489 = vmatpush1.bf16.msra.mxu1 %v1113_v3  ;;  %v1118_v6 = vld [vmem:[%s1648_s1 + $0x20] ss:$16 sps:$4 sm:$0xff]   ;;  %v1119_v7 = vld [vmem:[%s1648_s1 + $0x28] ss:$16 sps:$4 sm:$0xff]   ;;  %v1120_v8 = vld [vmem:[%s1648_s1 + $0x44] ss:$16 sps:$4 sm:$0xff]  }
   0x4   :  { %447 = vmatprep.subr.bf16.mxu0 %v1114_v4  ;;  %490 = vmatprep.subr.bf16.mxu1 %v1116_v5  ;;  %v1122_v9 = vld [vmem:[%s1648_s1 + $0x4c] ss:$16 sps:$4 sm:$0xff]   ;;  %v1124_v10 = vld [vmem:[%s1648_s1 + $0x40] ss:$16 sps:$4 sm:$0xff]   ;;  %v1125_v11 = vld [vmem:[%s1648_s1 + $0x48] ss:$16 sps:$4 sm:$0xff]  }
   0x5   :  { %v1126_v12 = vld [vmem:[%s1648_s1 + $0x64] ss:$16 sps:$4 sm:$0xff]   ;;  %v1128_v13 = vld [vmem:[%s1648_s1 + $0x6c] ss:$16 sps:$4 sm:$0xff]   ;;  %v1130_v14 = vld [vmem:[%s1648_s1 + $0x60] ss:$16 sps:$4 sm:$0xff]  }
   0x6   :  { %v1131_v15 = vld [vmem:[%s1648_s1 + $0x68] ss:$16 sps:$4 sm:$0xff]   ;;  %v1132_v16 = vld [vmem:[%s1648_s1 + $0x84] ss:$16 sps:$4 sm:$0xff]   ;;  %v1134_v17 = vld [vmem:[%s1648_s1 + $0x8c] ss:$16 sps:$4 sm:$0xff]  }
   0x7   :  { %448 = vmatpush1.bf16.msra.mxu0 %v1118_v6  ;;  %491 = vmatpush1.bf16.msra.mxu1 %v1119_v7  ;;  %v1136_v18 = vld [vmem:[%s1648_s1 + $0x80] ss:$16 sps:$4 sm:$0xff]   ;;  %v1137_v19 = vld [vmem:[%s1648_s1 + $0x88] ss:$16 sps:$4 sm:$0xff]   ;;  %v1138_v20 = vld [vmem:[%s1648_s1 + $0xa4] ss:$16 sps:$4 sm:$0xff]  }
   0x8   :  { %449 = vmatprep.subr.bf16.mxu0 %v1120_v8  ;;  %492 = vmatprep.subr.bf16.mxu1 %v1122_v9  ;;  %v1140_v21 = vld [vmem:[%s1648_s1 + $0xac] ss:$16 sps:$4 sm:$0xff]   ;;  %v1142_v22 = vld [vmem:[%s1648_s1 + $0xa0] ss:$16 sps:$4 sm:$0xff]   ;;  %v1143_v23 = vld [vmem:[%s1648_s1 + $0xa8] ss:$16 sps:$4 sm:$0xff]  }
   0x9   :  { %v1144_v24 = vld [vmem:[%s1648_s1 + $0xc4] ss:$16 sps:$4 sm:$0xff]   ;;  %v1146_v25 = vld [vmem:[%s1648_s1 + $0xcc] ss:$16 sps:$4 sm:$0xff]   ;;  %v1148_v26 = vld [vmem:[%s1648_s1 + $0xc0] ss:$16 sps:$4 sm:$0xff]  }
   0xa   :  { %v1149_v27 = vld [vmem:[%s1648_s1 + $0xc8] ss:$16 sps:$4 sm:$0xff]   ;;  %v1150_v28 = vld [vmem:[%s1648_s1 + $0xe4] ss:$16 sps:$4 sm:$0xff]   ;;  %v1152_v29 = vld [vmem:[%s1648_s1 + $0xec] ss:$16 sps:$4 sm:$0xff]  }
   0xb   :  { %450 = vmatpush1.bf16.msra.mxu0 %v1124_v10  ;;  %493 = vmatpush1.bf16.msra.mxu1 %v1125_v11  ;;  %v1154_v30 = vld [vmem:[%s1648_s1 + $0xe0] ss:$16 sps:$4 sm:$0xff]   ;;  %v1155_v31 = vld [vmem:[%s1648_s1 + $0xe8] ss:$16 sps:$4 sm:$0xff]   ;;  %v1156_v32 = vld [vmem:[%s1648_s1 + $0x104] ss:$16 sps:$4 sm:$0xff]  }
   0xc   :  { %451 = vmatprep.subr.bf16.mxu0 %v1126_v12  ;;  %494 = vmatprep.subr.bf16.mxu1 %v1128_v13  ;;  %v1158_v33 = vld [vmem:[%s1648_s1 + $0x10c] ss:$16 sps:$4 sm:$0xff]   ;;  %v1160_v34 = vld [vmem:[%s1648_s1 + $0x100] ss:$16 sps:$4 sm:$0xff]   ;;  %v1161_v35 = vld [vmem:[%s1648_s1 + $0x108] ss:$16 sps:$4 sm:$0xff]  }
   0xd   :  { %v1162_v36 = vld [vmem:[%s1648_s1 + $0x124] ss:$16 sps:$4 sm:$0xff]   ;;  %v1164_v37 = vld [vmem:[%s1648_s1 + $0x12c] ss:$16 sps:$4 sm:$0xff]   ;;  %v1166_v38 = vld [vmem:[%s1648_s1 + $0x120] ss:$16 sps:$4 sm:$0xff]  }
   0xe   :  { %v1167_v39 = vld [vmem:[%s1648_s1 + $0x128] ss:$16 sps:$4 sm:$0xff]   ;;  %v1168_v40 = vld [vmem:[%s1648_s1 + $0x144] ss:$16 sps:$4 sm:$0xff]   ;;  %v1170_v41 = vld [vmem:[%s1648_s1 + $0x14c] ss:$16 sps:$4 sm:$0xff]  }
   0xf   :  { %452 = vmatpush1.bf16.msra.mxu0 %v1130_v14  ;;  %495 = vmatpush1.bf16.msra.mxu1 %v1131_v15  ;;  %v1172_v42 = vld [vmem:[%s1648_s1 + $0x140] ss:$16 sps:$4 sm:$0xff]   ;;  %v1173_v43 = vld [vmem:[%s1648_s1 + $0x148] ss:$16 sps:$4 sm:$0xff]   ;;  %v1174_v44 = vld [vmem:[%s1648_s1 + $0x164] ss:$16 sps:$4 sm:$0xff]  }
  0x10   :  { %453 = vmatprep.subr.bf16.mxu0 %v1132_v16  ;;  %496 = vmatprep.subr.bf16.mxu1 %v1134_v17  ;;  %v1176_v45 = vld [vmem:[%s1648_s1 + $0x16c] ss:$16 sps:$4 sm:$0xff]   ;;  %v1178_v47 = vld [vmem:[%s1648_s1 + $0x160] ss:$16 sps:$4 sm:$0xff]   ;;  %v1179_v48 = vld [vmem:[%s1648_s1 + $0x168] ss:$16 sps:$4 sm:$0xff]  }
  0x11   :  { %v34_v46 = vld [vmem:[%s1649_s0 + $0x8] sm:$0xff]  ;;  %v36_v49 = vld [vmem:[%s1649_s0 + $0x18] sm:$0xff]  ;;  %v1180_v50 = vld [vmem:[%s1648_s1 + $0x184] ss:$16 sps:$4 sm:$0xff]  }
  0x12   :  { %v38_v51 = vpack.c.bf16 %v36_v49, %v34_v46  ;;  %v1182_v52 = vld [vmem:[%s1648_s1 + $0x18c] ss:$16 sps:$4 sm:$0xff]   ;;  %v1184_v53 = vld [vmem:[%s1648_s1 + $0x180] ss:$16 sps:$4 sm:$0xff]   ;;  %v1185_v54 = vld [vmem:[%s1648_s1 + $0x188] ss:$16 sps:$4 sm:$0xff]  }
  0x13   :  { %454 = vmatpush1.bf16.msra.mxu0 %v1136_v18  ;;  %497 = vmatpush1.bf16.msra.mxu1 %v1137_v19  ;;  %v1186_v55 = vld [vmem:[%s1648_s1 + $0x1a4] ss:$16 sps:$4 sm:$0xff]   ;;  %v1188_v56 = vld [vmem:[%s1648_s1 + $0x1ac] ss:$16 sps:$4 sm:$0xff]   ;;  %v1190_v57 = vld [vmem:[%s1648_s1 + $0x1a0] ss:$16 sps:$4 sm:$0xff]  }
  0x14   :  { %455 = vmatprep.subr.bf16.mxu0 %v1138_v20  ;;  %498 = vmatprep.subr.bf16.mxu1 %v1140_v21  ;;  %v1191_v58 = vld [vmem:[%s1648_s1 + $0x1a8] ss:$16 sps:$4 sm:$0xff]   ;;  %v1192_v59 = vld [vmem:[%s1648_s1 + $0x1c4] ss:$16 sps:$4 sm:$0xff]   ;;  %v1194_v60 = vld [vmem:[%s1648_s1 + $0x1cc] ss:$16 sps:$4 sm:$0xff]  }
  0x15   :  { %477 = vmatprep.mubr.bf16.mxu0 %v38_v51  ;;  %520 = vmatprep.mubr.bf16.mxu1 %v38_v51  ;;  %v1196_v61 = vld [vmem:[%s1648_s1 + $0x1c0] ss:$16 sps:$4 sm:$0xff]   ;;  %v1197_v62 = vld [vmem:[%s1648_s1 + $0x1c8] ss:$16 sps:$4 sm:$0xff]   ;;  %v1198_v63 = vld [vmem:[%s1648_s1 + $0x1e4] ss:$16 sps:$4 sm:$0xff]  }
  0x16   :  { %v1200_v0 = vld [vmem:[%s1648_s1 + $0x1ec] ss:$16 sps:$4 sm:$0xff]   ;;  %v1202_v1 = vld [vmem:[%s1648_s1 + $0x1e0] ss:$16 sps:$4 sm:$0xff]   ;;  %v1203_v2 = vld [vmem:[%s1648_s1 + $0x1e8] ss:$16 sps:$4 sm:$0xff]  }
  0x17   :  { %456 = vmatpush1.bf16.msra.mxu0 %v1142_v22  ;;  %499 = vmatpush1.bf16.msra.mxu1 %v1143_v23  ;;  %v33_v3 = vld [vmem:[%s1649_s0] sm:$0xff]  ;;  %v35_v4 = vld [vmem:[%s1649_s0 + $0x10] sm:$0xff]  ;;  %v1244_v22 = vmov 0   ;;  %v105_v23 = vlaneseq  ;;  %s1247_s0 = smov 64  }
  0x18   :  { %457 = vmatprep.subr.bf16.mxu0 %v1144_v24  ;;  %500 = vmatprep.subr.bf16.mxu1 %v1146_v25  ;;  %v1206_v5 = vld [vmem:[%s1650_s3 + $0x4] ss:$8 sps:$4 sm:$0xff]   ;;  %v37_v6 = vpack.c.bf16 %v35_v4, %v33_v3  ;;  %v1204_v7 = vld [vmem:[%s1650_s3] ss:$8 sps:$4 sm:$0xff]   ;;  %v1209_v8 = vld [vmem:[%s1650_s3 + $0x14] ss:$8 sps:$4 sm:$0xff]  }
  0x19   :  { %v1207_v9 = vld [vmem:[%s1650_s3 + $0x10] ss:$8 sps:$4 sm:$0xff]   ;;  %v1212_v10 = vld [vmem:[%s1650_s3 + $0x24] ss:$8 sps:$4 sm:$0xff]   ;;  %v1210_v11 = vld [vmem:[%s1650_s3 + $0x20] ss:$8 sps:$4 sm:$0xff]  }
  0x1a   :  { %v1215_v12 = vld [vmem:[%s1650_s3 + $0x34] ss:$8 sps:$4 sm:$0xff]   ;;  %v1213_v13 = vld [vmem:[%s1650_s3 + $0x30] ss:$8 sps:$4 sm:$0xff]   ;;  %v1218_v14 = vld [vmem:[%s1650_s3 + $0x44] ss:$8 sps:$4 sm:$0xff]  }
  0x1b   :  { %458 = vmatpush1.bf16.msra.mxu0 %v1148_v26  ;;  %501 = vmatpush1.bf16.msra.mxu1 %v1149_v27  ;;  %v1216_v15 = vld [vmem:[%s1650_s3 + $0x40] ss:$8 sps:$4 sm:$0xff]   ;;  %v1221_v16 = vld [vmem:[%s1650_s3 + $0x54] ss:$8 sps:$4 sm:$0xff]   ;;  %v1219_v17 = vld [vmem:[%s1650_s3 + $0x50] ss:$8 sps:$4 sm:$0xff]  }
  0x1c   :  { %459 = vmatprep.subr.bf16.mxu0 %v1150_v28  ;;  %502 = vmatprep.subr.bf16.mxu1 %v1152_v29  ;;  %v1224_v18 = vld [vmem:[%s1650_s3 + $0x64] ss:$8 sps:$4 sm:$0xff]   ;;  %v1222_v19 = vld [vmem:[%s1650_s3 + $0x60] ss:$8 sps:$4 sm:$0xff]   ;;  %v1227_v20 = vld [vmem:[%s1650_s3 + $0x74] ss:$8 sps:$4 sm:$0xff]  }
  0x1d   :  { %v1225_v21 = vld [vmem:[%s1650_s3 + $0x70] ss:$8 sps:$4 sm:$0xff]   ;;  %v1550_v24 = vshrl.u32 %v105_v23, 7  ;;  %v103_v27 = vld [vmem:[%s1651_s2] sm:$0xf]  ;;  %v1229_v3 = vld [vmem:[%s1652_s5 + $0x8] sm:$0xff]  }
  0x1e   :  { %v1230_v4 = vld [vmem:[%s1652_s5 + $0x10] sm:$0xff]  }
  0x1f   :  { %460 = vmatpush1.bf16.msra.mxu0 %v1154_v30  ;;  %503 = vmatpush1.bf16.msra.mxu1 %v1155_v31  ;;  %v107_v25 = vsub.s32 0, %v1550_v24  ;;  %v115_v26 = vsub.s32 2, %v1550_v24  ;;  %v111_v28 = vsub.s32 1, %v1550_v24  ;;  %v119_v29 = vsub.s32 3, %v1550_v24 }
  0x20   :  { %461 = vmatprep.subr.bf16.mxu0 %v1156_v32  ;;  %504 = vmatprep.subr.bf16.mxu1 %v1158_v33 }
  0x21   :  { %v108_v30 = vrot.slane %v103_v27, %v107_v25  ;;  %v116_v31 = vrot.slane %v103_v27, %v115_v26  ;;  %v112_v32 = vrot.slane %v103_v27, %v111_v28  ;;  %v120_v33 = vrot.slane %v103_v27, %v119_v29  ;;  %v1236_v26 = vld [vmem:[%s1654_s7] sm:$0xff]  }
  0x23   :  { %462 = vmatpush1.bf16.msra.mxu0 %v1160_v34  ;;  %505 = vmatpush1.bf16.msra.mxu1 %v1161_v35 }
  0x24   :  { %463 = vmatprep.subr.bf16.mxu0 %v1162_v36  ;;  %506 = vmatprep.subr.bf16.mxu1 %v1164_v37 }
  0x27   :  { %464 = vmatpush1.bf16.msra.mxu0 %v1166_v38  ;;  %507 = vmatpush1.bf16.msra.mxu1 %v1167_v39 }
  0x28   :  { %465 = vmatprep.subr.bf16.mxu0 %v1168_v40  ;;  %508 = vmatprep.subr.bf16.mxu1 %v1170_v41 }
  0x2b   :  { %466 = vmatpush1.bf16.msra.mxu0 %v1172_v42  ;;  %509 = vmatpush1.bf16.msra.mxu1 %v1173_v43 }
  0x2c   :  { %467 = vmatprep.subr.bf16.mxu0 %v1174_v44  ;;  %510 = vmatprep.subr.bf16.mxu1 %v1176_v45 }
  0x2f   :  { %468 = vmatpush1.bf16.msra.mxu0 %v1178_v47  ;;  %511 = vmatpush1.bf16.msra.mxu1 %v1179_v48 }
  0x30   :  { %469 = vmatprep.subr.bf16.mxu0 %v1180_v50  ;;  %512 = vmatprep.subr.bf16.mxu1 %v1182_v52 }
  0x33   :  { %470 = vmatpush1.bf16.msra.mxu0 %v1184_v53  ;;  %513 = vmatpush1.bf16.msra.mxu1 %v1185_v54 }
  0x34   :  { %471 = vmatprep.subr.bf16.mxu0 %v1186_v55  ;;  %514 = vmatprep.subr.bf16.mxu1 %v1188_v56 }
  0x37   :  { %472 = vmatpush1.bf16.msra.mxu0 %v1190_v57  ;;  %515 = vmatpush1.bf16.msra.mxu1 %v1191_v58 }
  0x38   :  { %473 = vmatprep.subr.bf16.mxu0 %v1192_v59  ;;  %516 = vmatprep.subr.bf16.mxu1 %v1194_v60 }
  0x3b   :  { %474 = vmatpush1.bf16.msra.mxu0 %v1196_v61  ;;  %517 = vmatpush1.bf16.msra.mxu1 %v1197_v62 }
  0x3c   :  { %475 = vmatprep.subr.bf16.mxu0 %v1198_v63  ;;  %518 = vmatprep.subr.bf16.mxu1 %v1200_v0 }
  0x3f   :  { %476 = vmatpush1.bf16.msra.mxu0 %v1202_v1  ;;  %519 = vmatpush1.bf16.msra.mxu1 %v1203_v2  ;;  %v1245_v1 = vmov 0.0   ;;  %v1228_v2 = vld [vmem:[%s1652_s5] sm:$0xff]  }
  0x40   :  { %654 = vmatprep.subr.bf16.mxu0 %v1206_v5  ;;  %1059 = vmatprep.subr.bf16.mxu1 %v1245_v1  ;;  %v1231_v5 = vld [vmem:[%s1652_s5 + $0x18] sm:$0xff]  }
  0x42   :  { %478 = vmatmul.mubr.bf16.vlgmr.msra.gmra.mrb[0].mxu0 %v37_v6  ;;  %521 = vmatmul.mubr.bf16.vlgmr.msra.gmra.mrb[0].mxu1 %v37_v6  ;;  %v1232_v6 = vld [vmem:[%s1652_s5 + $0x20] sm:$0xff]  }
  0x43   :  { %655 = vmatpush1.bf16.msra.mxu0 %v1204_v7  ;;  %686 = vmatprep.mubr.bf16.mxu0 %v1244_v22  ;;  %v1233_v7 = vld [vmem:[%s1652_s5 + $0x28] sm:$0xff]  }
  0x44   :  { %656 = vmatprep.subr.bf16.mxu0 %v1209_v8  ;;  %1060 = vmatpush3.bf16.msra.mxu1 %v1228_v2  ;;  %v1234_v8 = vld [vmem:[%s1652_s5 + $0x30] sm:$0xff]  }
  0x45   :  { %1061 = vmatprep.subr.bf16.mxu1 %v1245_v1  ;;  %1075 = vmatprep.mubr.msk.bf16.mxu1 %vm1246_vm0, %v1245_v1 }
  0x47   :  { %657 = vmatpush1.bf16.msra.mxu0 %v1207_v9  ;;  %v562_v9 = vld [vmem:[%s1653_s4] sm:$0x3] }
  0x48   :  { %658 = vmatprep.subr.bf16.mxu0 %v1212_v10  ;;  %1062 = vmatpush3.bf16.msra.mxu1 %v1229_v3  ;;  %v567_v10 = vrot.slane %v562_v9, %v107_v25 }
  0x49   :  { %1063 = vmatprep.subr.bf16.mxu1 %v1245_v1 }
  0x4b   :  { %659 = vmatpush1.bf16.msra.mxu0 %v1210_v11  ;;  %v571_v11 = vrot.slane %v562_v9, %v111_v28  ;;  %v1237_v28 = vld [vmem:[%s1654_s7 + $0x8] sm:$0xff]  }
  0x4c   :  { %660 = vmatprep.subr.bf16.mxu0 %v1215_v12  ;;  %1064 = vmatpush3.bf16.msra.mxu1 %v1230_v4 }
  0x4d   :  { %1065 = vmatprep.subr.bf16.mxu1 %v1245_v1 }
  0x4f   :  { %661 = vmatpush1.bf16.msra.mxu0 %v1213_v13  ;;  %v1235_v13 = vld [vmem:[%s1652_s5 + $0x38] sm:$0xff]  }
  0x50   :  { %662 = vmatprep.subr.bf16.mxu0 %v1218_v14  ;;  %1066 = vmatpush3.bf16.msra.mxu1 %v1231_v5 }
  0x51   :  { %1067 = vmatprep.subr.bf16.mxu1 %v1245_v1 }
  0x53   :  { %663 = vmatpush1.bf16.msra.mxu0 %v1216_v15 }
  0x54   :  { %664 = vmatprep.subr.bf16.mxu0 %v1221_v16  ;;  %1068 = vmatpush3.bf16.msra.mxu1 %v1232_v6 }
  0x55   :  { %1069 = vmatprep.subr.bf16.mxu1 %v1245_v1 }
  0x57   :  { %665 = vmatpush1.bf16.msra.mxu0 %v1219_v17 }
  0x58   :  { %666 = vmatprep.subr.bf16.mxu0 %v1224_v18  ;;  %1070 = vmatpush3.bf16.msra.mxu1 %v1233_v7 }
  0x59   :  { %1071 = vmatprep.subr.bf16.mxu1 %v1245_v1 }
  0x5b   :  { %667 = vmatpush1.bf16.msra.mxu0 %v1222_v19 }
  0x5c   :  { %668 = vmatprep.subr.bf16.mxu0 %v1227_v20  ;;  %1072 = vmatpush3.bf16.msra.mxu1 %v1234_v8 }
  0x5d   :  { %1073 = vmatprep.subr.bf16.mxu1 %v1245_v1 }
  0x5f   :  { %669 = vmatpush1.bf16.msra.mxu0 %v1225_v21 }
  0x60   :  { %1079 = vmatprep.subr.bf16.mxu0 %v1245_v1  ;;  %1074 = vmatpush3.bf16.msra.mxu1 %v1235_v13 }
 0x115   :  { %v479_v34 = vpop.f32.mrb[0].mxu0  ;;  %v522_v35 = vpop.f32.mrb[0].mxu1 }
 0x116   :  { %v480_v36 = vadd.f32 %v479_v34, %v108_v30  ;;  %v523_v37 = vadd.f32 %v522_v35, %v116_v31  ;;  %v481_v38 = vpop.f32.mrb[1].mxu0  ;;  %v524_v39 = vpop.f32.mrb[1].mxu1 }
 0x117   :  { %v482_v40 = vadd.f32 %v481_v38, %v112_v32  ;;  %v525_v41 = vadd.f32 %v524_v39, %v120_v33  ;;  %v483_v42 = vpop.f32.mrb[2].mxu0  ;;  %v526_v43 = vpop.f32.mrb[2].mxu1 }
 0x118   :  { %v531_v44 = vmax.f32 %v480_v36, 0.0  ;;  %v533_v45 = vmax.f32 %v523_v37, 0.0  ;;  %v484_v46 = vadd.f32 %v483_v42, %v108_v30  ;;  %v527_v47 = vadd.f32 %v526_v43, %v116_v31  ;;  %v485_v48 = vpop.f32.mrb[3].mxu0  ;;  %v528_v49 = vpop.f32.mrb[3].mxu1  ;;  %v1238_v30 = vld [vmem:[%s1654_s7 + $0x10] sm:$0xff]   ;;  %v1239_v31 = vld [vmem:[%s1654_s7 + $0x18] sm:$0xff]  }
 0x119   :  { %v532_v50 = vmax.f32 %v482_v40, 0.0  ;;  %v534_v51 = vmax.f32 %v525_v41, 0.0  ;;  %v486_v52 = vadd.f32 %v485_v48, %v112_v32  ;;  %v529_v53 = vadd.f32 %v528_v49, %v120_v33  ;;  %v1240_v32 = vld [vmem:[%s1654_s7 + $0x20] sm:$0xff]   ;;  %v1241_v33 = vld [vmem:[%s1654_s7 + $0x28] sm:$0xff]   ;;  %v1242_v40 = vld [vmem:[%s1654_s7 + $0x30] sm:$0xff]  }
 0x11a   :  { %v535_v54 = vmax.f32 %v484_v46, 0.0  ;;  %v537_v55 = vmax.f32 %v527_v47, 0.0  ;;  %v1243_v41 = vld [vmem:[%s1654_s7 + $0x38] sm:$0xff]   ;;  %v1023_v42 = vld [vmem:[%s1655_s6] ss:$0 sm:$0xff] }
 0x11b   :  { %v539_v56 = vmax.f32 %v531_v44, %v532_v50  ;;  %v541_v57 = vmax.f32 %v533_v45, %v534_v51  ;;  %v536_v58 = vmax.f32 %v486_v52, 0.0  ;;  %v538_v59 = vmax.f32 %v529_v53, 0.0  ;;  %v1032_v52 = vld [vmem:[%s1656_s8] ss:$0 sm:$0xff] }
 0x11d   :  { %v543_v60 = vmax.f32 %v539_v56, %v541_v57  ;;  %v540_v61 = vmax.f32 %v535_v54, %v536_v58  ;;  %v542_v62 = vmax.f32 %v537_v55, %v538_v59 }
 0x11f   :  { %v544_v63 = vmax.f32 %v540_v61, %v542_v62 }
 0x121   :  { %v545_v0 = vpack.c.bf16 %v544_v63, %v543_v60 }
 0x123   :  { %687 = vmatmul.mubr.bf16.vlgmr.msra.gmra.mrb[4].mxu0 %v545_v0 }
 0x124   :  { %1095 = vmatprep.mubr.msk.bf16.mxu0 %vm1246_vm0, %v1245_v1  ;;  %1080 = vmatpush3.bf16.msra.mxu0 %v1236_v26 }
 0x125   :  { %1081 = vmatprep.subr.bf16.mxu0 %v1245_v1 }
 0x128   :  { %1082 = vmatpush3.bf16.msra.mxu0 %v1237_v28 }
 0x129   :  { %1083 = vmatprep.subr.bf16.mxu0 %v1245_v1 }
 0x12c   :  { %1084 = vmatpush3.bf16.msra.mxu0 %v1238_v30 }
 0x12d   :  { %1085 = vmatprep.subr.bf16.mxu0 %v1245_v1 }
 0x130   :  { %1086 = vmatpush3.bf16.msra.mxu0 %v1239_v31 }
 0x131   :  { %1087 = vmatprep.subr.bf16.mxu0 %v1245_v1 }
 0x134   :  { %1088 = vmatpush3.bf16.msra.mxu0 %v1240_v32 }
 0x135   :  { %1089 = vmatprep.subr.bf16.mxu0 %v1245_v1 }
 0x138   :  { %1090 = vmatpush3.bf16.msra.mxu0 %v1241_v33 }
 0x139   :  { %1091 = vmatprep.subr.bf16.mxu0 %v1245_v1 }
 0x13c   :  { %1092 = vmatpush3.bf16.msra.mxu0 %v1242_v40 }
 0x13d   :  { %1093 = vmatprep.subr.bf16.mxu0 %v1245_v1 }
 0x140   :  { %1094 = vmatpush3.bf16.msra.mxu0 %v1243_v41 }
 0x1f6   :  { %v688_v12 = vpop.f32.mrb[4].mxu0 }
 0x1f7   :  { %v689_v14 = vadd.f32 %v688_v12, %v567_v10  ;;  %v690_v15 = vpop.f32.mrb[5].mxu0 }
 0x1f8   :  { %v691_v16 = vadd.f32 %v690_v15, %v571_v11  ;;  %v692_v17 = vpop.f32.mrb[6].mxu0 }
 0x1f9   :  { %v697_v18 = vmax.f32 %v689_v14, 0.0  ;;  %v693_v19 = vadd.f32 %v692_v17, %v567_v10  ;;  %v694_v20 = vpop.f32.mrb[7].mxu0 }
 0x1fa   :  { %v698_v21 = vmax.f32 %v691_v16, 0.0  ;;  %v695_v22 = vadd.f32 %v694_v20, %v571_v11 }
 0x1fb   :  { %v699_v23 = vmax.f32 %v693_v19, 0.0 }
 0x1fc   :  { %v701_v24 = vmax.f32 %v697_v18, %v698_v21  ;;  %v700_v25 = vmax.f32 %v695_v22, 0.0 }
 0x1fe   :  { %v702_v27 = vmax.f32 %v699_v23, %v700_v25 }
 0x200   :  { %v1103_v29 = vpack.i.bf16 %v702_v27, %v701_v24 }
 0x202   :  { %1104 = vrot.lane.b32.xlu0 %v1103_v29, %s1247_s0 }
 0x274   :  { %v1105_v34 = vpop.permute.xlu0 %1104 }
 0x275   :  { %v1107_v35 = vunpack.i.h.bf16 %v1105_v34  ;;  %v1106_v36 = vunpack.i.l.bf16 %v1105_v34 }
 0x277   :  { %v708_v37 = vmax.f32 %v702_v27, %v1107_v35  ;;  %v707_v38 = vmax.f32 %v701_v24, %v1106_v36 }
 0x279   :  { %v709_v39 = vpack.c.bf16 %v708_v37, %v707_v38 }
 0x27b   :  { %1076 = vmatmul.mubr.bf16.vlgmr.msra.gmra.mrb[4].mxu1 %v709_v39 }
 0x34e   :  { %v815_v43 = vpop.f32.mrb[4].mxu1 }
 0x34f   :  { %v816_v44 = vadd.f32 %v1023_v42, %v815_v43  ;;  %v1077_v45 = vpop.f32.mrb[5].mxu1 }
 0x350   :  { %v818_v46 = vpop.f32.mrb[6].mxu1 }
 0x351   :  { %v819_v47 = vadd.f32 %v1023_v42, %v818_v46  ;;  %v1078_v48 = vpop.f32.mrb[7].mxu1  ;;  %v822_v49 = vmax.f32 %v816_v44, 0.0 }
 0x353   :  { %v823_v50 = vmax.f32 %v819_v47, 0.0 }
 0x355   :  { %v824_v51 = vpack.c.bf16 %v823_v50, %v822_v49 }
 0x357   :  { %1096 = vmatmul.mubr.bf16.vlgmr.msra.gmra.mrb[8].mxu0 %v824_v51 }
 0x42a   :  { %v930_v53 = vpop.f32.mrb[8].mxu0 }
 0x42b   :  { %v931_v54 = vadd.f32 %v1032_v52, %v930_v53  ;;  %v1097_v55 = vpop.f32.mrb[9].mxu0 }
 0x42c   :  { %v933_v56 = vpop.f32.mrb[10].mxu0 }
 0x42d   :  { %937 = vst [vmem:[%s1657_s9] sm:$0xff] %v931_v54  ;;  %v934_v57 = vadd.f32 %v1032_v52, %v933_v56  ;;  %v1098_v58 = vpop.f32.mrb[11].mxu0 }
 0x42f   :  { %938 = vst [vmem:[%s1657_s9 + $0x8] sm:$0xff] %v934_v57 }

</bundles_post_ra>
